<compile_context>
chip_gen: v7x
topology: tpu7x:2x2x1
jax: 0.10.0
libtpu: 0.0.40
codegen_flags: <defaults>
</compile_context>

<pallas_src>
import numpy as np
import jax
import jax.numpy as jnp
from jax.experimental import pallas as pl
from jax.experimental.pallas import tpu as pltpu

N, C, H, W = 2, 3, 16, 16
COUT, KH, KW = 8, 3, 3
NUM_CLASSES = 10
HW = H * W
NPIX = N * HW


# ------------------------------ fused kernel --------------------------------

def _fused_forward_kernel(x_ref, mean_ref, inv_std_ref, w_ref, b_ref,
                          mask_ref, fcw_ref, fcb_ref, out_ref):
    # --- gather raw (N*C, HW) rows into channel-major (C, N*HW).  Each lane
    #     piece is 256 wide (128-aligned), so these are plain vreg copies.
    xcn = jnp.concatenate(
        [jnp.concatenate([x_ref[nb * C + c:nb * C + c + 1, :] for nb in range(N)],
                         axis=1)
         for c in range(C)],
        axis=0)                                                     # (C, NPIX)

    # --- transforms: per-channel normalize in one VALU pass.
    xn = (xcn - mean_ref[...]) * inv_std_ref[...]                   # (C, NPIX)

    # --- im2col: 9 XLU rolls + per-tap validity masks -> (9*C, NPIX) stack.
    #     roll wraparound only ever lands where the mask is 0, so this exactly
    #     reproduces zero-padding ('SAME') semantics.
    masks = mask_ref[...]                                           # (9, NPIX)
    cols = []
    for kh in range(KH):
        for kw in range(KW):
            tap = kh * KW + kw
            off = (kh - 1) * W + (kw - 1)
            shifted = xn if off == 0 else pltpu.roll(xn, shift=(-off) % NPIX, axis=1)
            cols.append(shifted * masks[tap:tap + 1, :])            # (C, NPIX)
    stack = jnp.concatenate(cols, axis=0)                           # (27, NPIX)

    # --- conv 3x3 (pad=1) as ONE lane-dense MXU matmul, bias + ReLU.
    hidden = jnp.dot(w_ref[...], stack,
                     preferred_element_type=jnp.float32)            # (COUT, NPIX)
    hidden = jnp.maximum(hidden + b_ref[...], 0.0)

    # --- global average pool (aligned cross-lane reductions) + FC on VPU/XLU,
    #     emitted directly as (N, NUM_CLASSES).
    fcw = fcw_ref[...]                                              # (COUT, CLS)
    inv_hw = 1.0 / HW
    rows = []
    for nb in range(N):
        pooled = jnp.sum(hidden[:, nb * HW:(nb + 1) * HW],
                         axis=1, keepdims=True) * inv_hw            # (COUT, 1)
        rows.append(jnp.sum(pooled * fcw, axis=0, keepdims=True))   # (1, CLS)
    out_ref[...] = jnp.concatenate(rows, axis=0) + fcb_ref[...]     # (N, CLS)


# ------------------------- host-side constant tables ------------------------

def _conv_tap_masks(n, h, w):
    """(9, n*h*w) f32: 1 where tap (kh,kw) lands inside the image, else 0."""
    hw = h * w
    p = np.arange(n * hw)
    i = (p % hw) // w
    j = p % w
    m = np.zeros((KH * KW, n * hw), np.float32)
    for kh in range(KH):
        for kw in range(KW):
            dh, dw = kh - 1, kw - 1
            ok = (i + dh >= 0) & (i + dh < h) & (j + dw >= 0) & (j + dw < w)
            m[kh * KW + kw] = ok.astype(np.float32)
    return jnp.asarray(m)


# --------------------------------- forward ----------------------------------

def model_with_transforms_forward(x, params):
    n, c, h, w = x.shape
    hw = h * w

    x2d = x.reshape(n * c, hw)                         # pure reshape (no copy)
    mean_col = params["mean"].reshape(c, 1)
    inv_std_col = (1.0 / params["std"]).reshape(c, 1)
    # w2[o, (kh*KW + kw)*C + c] = conv_w[o, c, kh, kw]  -> matches stack rows
    w2 = params["conv_w"].transpose(0, 2, 3, 1).reshape(COUT, KH * KW * c)
    conv_b = params["conv_b"].reshape(COUT, 1)
    fcw = params["fc_w"]                               # (COUT, NUM_CLASSES)
    fcb = params["fc_b"].reshape(1, NUM_CLASSES)
    masks = _conv_tap_masks(n, h, w)                   # compile-time constant

    vmem = pl.BlockSpec(memory_space=pltpu.MemorySpace.VMEM)

    # Gridless on purpose: whole working set < 0.2 MiB, single TC latency-bound.
    return pl.pallas_call(
        _fused_forward_kernel,
        out_shape=jax.ShapeDtypeStruct((n, NUM_CLASSES), jnp.float32),
        in_specs=[vmem] * 8,
        out_specs=vmem,
    )(x2d, mean_col, inv_std_col, w2, conv_b, masks, fcw, fcb)


# --------------------------- pure-JAX reference ------------------------------

def reference_forward(x, params):
    mean = params["mean"].reshape(1, C, 1, 1)
    std = params["std"].reshape(1, C, 1, 1)
    xn = (x - mean) / std
    y = jax.lax.conv_general_dilated(
        xn, params["conv_w"], window_strides=(1, 1), padding="SAME",
        dimension_numbers=("NCHW", "OIHW", "NCHW"))
    y = jnp.maximum(y + params["conv_b"].reshape(1, COUT, 1, 1), 0.0)
    pooled = y.mean(axis=(2, 3))
    return pooled @ params["fc_w"] + params["fc_b"]


# ----------------------------------- main ------------------------------------

if __name__ == "__main__":
    key = jax.random.PRNGKey(0)
    k_x, k_cw, k_cb, k_fw, k_fb = jax.random.split(key, 5)

    x = jax.random.normal(k_x, (N, C, H, W), dtype=jnp.float32)

    params = {
        # torchvision-style normalization constants (deterministic)
        "mean": jnp.array([0.485, 0.456, 0.406], dtype=jnp.float32),
        "std": jnp.array([0.229, 0.224, 0.225], dtype=jnp.float32),
        # Conv2d(3, 8, kernel_size=3, padding=1)
        "conv_w": 0.1 * jax.random.normal(k_cw, (COUT, C, KH, KW), jnp.float32),
        "conv_b": 0.1 * jax.random.normal(k_cb, (COUT,), jnp.float32),
        # Linear(8, 10)
        "fc_w": 0.1 * jax.random.normal(k_fw, (COUT, NUM_CLASSES), jnp.float32),
        "fc_b": 0.1 * jax.random.normal(k_fb, (NUM_CLASSES,), jnp.float32),
    }

    fwd = jax.jit(model_with_transforms_forward)
    y = fwd(x, params)
    jax.block_until_ready(y)

    y_ref = reference_forward(x, params)
    assert y.shape == (N, NUM_CLASSES)
    assert jnp.allclose(y, y_ref, atol=1e-4, rtol=1e-4), "mismatch vs reference"

    print("KERNEL_OK")
</pallas_src>

<mosaic_0001>
module attributes {stable_mosaic.version = 11 : i64} {
  func.func @_fused_forward_kernel(%arg0: memref<6x256xf32, #tpu.memory_space<vmem>>, %arg1: memref<3x1xf32, #tpu.memory_space<vmem>>, %arg2: memref<3x1xf32, #tpu.memory_space<vmem>>, %arg3: memref<8x27xf32, #tpu.memory_space<vmem>>, %arg4: memref<8x1xf32, #tpu.memory_space<vmem>>, %arg5: memref<9x512xf32, #tpu.memory_space<vmem>>, %arg6: memref<8x10xf32, #tpu.memory_space<vmem>>, %arg7: memref<1x10xf32, #tpu.memory_space<vmem>>, %arg8: memref<2x10xf32, #tpu.memory_space<vmem>>) attributes {dimension_semantics = [], scalar_prefetch = 0 : i64, scratch_operands = 0 : i64, tpu.core_type = #tpu.core_type<tc>} {
    %c0 = arith.constant 0 : index
    %c0_0 = arith.constant 0 : index
    %0 = vector.load %arg0[%c0, %c0_0] : memref<6x256xf32, #tpu.memory_space<vmem>>, vector<1x256xf32>
    %c3 = arith.constant 3 : index
    %c0_1 = arith.constant 0 : index
    %1 = vector.load %arg0[%c3, %c0_1] : memref<6x256xf32, #tpu.memory_space<vmem>>, vector<1x256xf32>
    %2 = tpu.concatenate %0, %1 in 1 : vector<1x256xf32>, vector<1x256xf32> -> vector<1x512xf32>
    %c1 = arith.constant 1 : index
    %c0_2 = arith.constant 0 : index
    %3 = vector.load %arg0[%c1, %c0_2] : memref<6x256xf32, #tpu.memory_space<vmem>>, vector<1x256xf32>
    %c4 = arith.constant 4 : index
    %c0_3 = arith.constant 0 : index
    %4 = vector.load %arg0[%c4, %c0_3] : memref<6x256xf32, #tpu.memory_space<vmem>>, vector<1x256xf32>
    %5 = tpu.concatenate %3, %4 in 1 : vector<1x256xf32>, vector<1x256xf32> -> vector<1x512xf32>
    %c2 = arith.constant 2 : index
    %c0_4 = arith.constant 0 : index
    %6 = vector.load %arg0[%c2, %c0_4] : memref<6x256xf32, #tpu.memory_space<vmem>>, vector<1x256xf32>
    %c5 = arith.constant 5 : index
    %c0_5 = arith.constant 0 : index
    %7 = vector.load %arg0[%c5, %c0_5] : memref<6x256xf32, #tpu.memory_space<vmem>>, vector<1x256xf32>
    %8 = tpu.concatenate %6, %7 in 1 : vector<1x256xf32>, vector<1x256xf32> -> vector<1x512xf32>
    %9 = tpu.concatenate %2, %5, %8 in 0 : vector<1x512xf32>, vector<1x512xf32>, vector<1x512xf32> -> vector<3x512xf32>
    %c0_6 = arith.constant 0 : index
    %c0_7 = arith.constant 0 : index
    %10 = vector.load %arg1[%c0_6, %c0_7] : memref<3x1xf32, #tpu.memory_space<vmem>>, vector<3x1xf32>
    %11 = vector.broadcast %10 : vector<3x1xf32> to vector<3x512xf32>
    %12 = arith.subf %9, %11 : vector<3x512xf32>
    %c0_8 = arith.constant 0 : index
    %c0_9 = arith.constant 0 : index
    %13 = vector.load %arg2[%c0_8, %c0_9] : memref<3x1xf32, #tpu.memory_space<vmem>>, vector<3x1xf32>
    %14 = vector.broadcast %13 : vector<3x1xf32> to vector<3x512xf32>
    %15 = arith.mulf %12, %14 : vector<3x512xf32>
    %c0_10 = arith.constant 0 : index
    %c0_11 = arith.constant 0 : index
    %16 = vector.load %arg5[%c0_10, %c0_11] : memref<9x512xf32, #tpu.memory_space<vmem>>, vector<9x512xf32>
    %c17_i32 = arith.constant 17 : i32
    %17 = tpu.dynamic_rotate %15 by %c17_i32 dim 1 : vector<3x512xf32>, i32 -> vector<3x512xf32>
    %18 = vector.extract_strided_slice %16 {offsets = [0, 0], sizes = [1, 512], strides = [1, 1]} : vector<9x512xf32> to vector<1x512xf32>
    %19 = vector.broadcast %18 : vector<1x512xf32> to vector<3x512xf32>
    %20 = arith.mulf %17, %19 : vector<3x512xf32>
    %c16_i32 = arith.constant 16 : i32
    %21 = tpu.dynamic_rotate %15 by %c16_i32 dim 1 : vector<3x512xf32>, i32 -> vector<3x512xf32>
    %22 = vector.extract_strided_slice %16 {offsets = [1, 0], sizes = [1, 512], strides = [1, 1]} : vector<9x512xf32> to vector<1x512xf32>
    %23 = vector.broadcast %22 : vector<1x512xf32> to vector<3x512xf32>
    %24 = arith.mulf %21, %23 : vector<3x512xf32>
    %c15_i32 = arith.constant 15 : i32
    %25 = tpu.dynamic_rotate %15 by %c15_i32 dim 1 : vector<3x512xf32>, i32 -> vector<3x512xf32>
    %26 = vector.extract_strided_slice %16 {offsets = [2, 0], sizes = [1, 512], strides = [1, 1]} : vector<9x512xf32> to vector<1x512xf32>
    %27 = vector.broadcast %26 : vector<1x512xf32> to vector<3x512xf32>
    %28 = arith.mulf %25, %27 : vector<3x512xf32>
    %c1_i32 = arith.constant 1 : i32
    %29 = tpu.dynamic_rotate %15 by %c1_i32 dim 1 : vector<3x512xf32>, i32 -> vector<3x512xf32>
    %30 = vector.extract_strided_slice %16 {offsets = [3, 0], sizes = [1, 512], strides = [1, 1]} : vector<9x512xf32> to vector<1x512xf32>
    %31 = vector.broadcast %30 : vector<1x512xf32> to vector<3x512xf32>
    %32 = arith.mulf %29, %31 : vector<3x512xf32>
    %33 = vector.extract_strided_slice %16 {offsets = [4, 0], sizes = [1, 512], strides = [1, 1]} : vector<9x512xf32> to vector<1x512xf32>
    %34 = vector.broadcast %33 : vector<1x512xf32> to vector<3x512xf32>
    %35 = arith.mulf %15, %34 : vector<3x512xf32>
    %c511_i32 = arith.constant 511 : i32
    %36 = tpu.dynamic_rotate %15 by %c511_i32 dim 1 : vector<3x512xf32>, i32 -> vector<3x512xf32>
    %37 = vector.extract_strided_slice %16 {offsets = [5, 0], sizes = [1, 512], strides = [1, 1]} : vector<9x512xf32> to vector<1x512xf32>
    %38 = vector.broadcast %37 : vector<1x512xf32> to vector<3x512xf32>
    %39 = arith.mulf %36, %38 : vector<3x512xf32>
    %c497_i32 = arith.constant 497 : i32
    %40 = tpu.dynamic_rotate %15 by %c497_i32 dim 1 : vector<3x512xf32>, i32 -> vector<3x512xf32>
    %41 = vector.extract_strided_slice %16 {offsets = [6, 0], sizes = [1, 512], strides = [1, 1]} : vector<9x512xf32> to vector<1x512xf32>
    %42 = vector.broadcast %41 : vector<1x512xf32> to vector<3x512xf32>
    %43 = arith.mulf %40, %42 : vector<3x512xf32>
    %c496_i32 = arith.constant 496 : i32
    %44 = tpu.dynamic_rotate %15 by %c496_i32 dim 1 : vector<3x512xf32>, i32 -> vector<3x512xf32>
    %45 = vector.extract_strided_slice %16 {offsets = [7, 0], sizes = [1, 512], strides = [1, 1]} : vector<9x512xf32> to vector<1x512xf32>
    %46 = vector.broadcast %45 : vector<1x512xf32> to vector<3x512xf32>
    %47 = arith.mulf %44, %46 : vector<3x512xf32>
    %c495_i32 = arith.constant 495 : i32
    %48 = tpu.dynamic_rotate %15 by %c495_i32 dim 1 : vector<3x512xf32>, i32 -> vector<3x512xf32>
    %49 = vector.extract_strided_slice %16 {offsets = [8, 0], sizes = [1, 512], strides = [1, 1]} : vector<9x512xf32> to vector<1x512xf32>
    %50 = vector.broadcast %49 : vector<1x512xf32> to vector<3x512xf32>
    %51 = arith.mulf %48, %50 : vector<3x512xf32>
    %52 = tpu.concatenate %20, %24, %28, %32, %35, %39, %43, %47, %51 in 0 : vector<3x512xf32>, vector<3x512xf32>, vector<3x512xf32>, vector<3x512xf32>, vector<3x512xf32>, vector<3x512xf32>, vector<3x512xf32>, vector<3x512xf32>, vector<3x512xf32> -> vector<27x512xf32>
    %c0_12 = arith.constant 0 : index
    %c0_13 = arith.constant 0 : index
    %53 = vector.load %arg3[%c0_12, %c0_13] : memref<8x27xf32, #tpu.memory_space<vmem>>, vector<8x27xf32>
    %cst = arith.constant dense<0.000000e+00> : vector<8x512xf32>
    %54 = tpu.matmul %53, %52, %cst {dimension_numbers = #tpu.dot_dimension_numbers<[1], [0], [0], [1], [0, 0, 1, 1], [], []>} : vector<8x27xf32>, vector<27x512xf32>, vector<8x512xf32> -> vector<8x512xf32>
    %c0_14 = arith.constant 0 : index
    %c0_15 = arith.constant 0 : index
    %55 = vector.load %arg4[%c0_14, %c0_15] : memref<8x1xf32, #tpu.memory_space<vmem>>, vector<8x1xf32>
    %56 = vector.broadcast %55 : vector<8x1xf32> to vector<8x512xf32>
    %57 = arith.addf %54, %56 : vector<8x512xf32>
    %cst_16 = arith.constant 0.000000e+00 : f32
    %58 = vector.broadcast %cst_16 : f32 to vector<8x512xf32>
    %59 = arith.maximumf %57, %58 : vector<8x512xf32>
    %c0_17 = arith.constant 0 : index
    %c0_18 = arith.constant 0 : index
    %60 = vector.load %arg6[%c0_17, %c0_18] : memref<8x10xf32, #tpu.memory_space<vmem>>, vector<8x10xf32>
    %61 = vector.extract_strided_slice %59 {offsets = [0, 0], sizes = [8, 256], strides = [1, 1]} : vector<8x512xf32> to vector<8x256xf32>
    %cst_19 = arith.constant dense<0.000000e+00> : vector<8xf32>
    %62 = vector.multi_reduction <add>, %61, %cst_19 [1] : vector<8x256xf32> to vector<8xf32>
    %63 = vector.shape_cast %62 : vector<8xf32> to vector<8x1xf32>
    %cst_20 = arith.constant 3.906250e-03 : f32
    %64 = vector.broadcast %cst_20 : f32 to vector<8x1xf32>
    %65 = arith.mulf %63, %64 : vector<8x1xf32>
    %66 = vector.broadcast %65 : vector<8x1xf32> to vector<8x10xf32>
    %67 = arith.mulf %66, %60 : vector<8x10xf32>
    %cst_21 = arith.constant dense<0.000000e+00> : vector<10xf32>
    %68 = vector.multi_reduction <add>, %67, %cst_21 [0] : vector<8x10xf32> to vector<10xf32>
    %69 = vector.shape_cast %68 : vector<10xf32> to vector<1x10xf32>
    %70 = vector.extract_strided_slice %59 {offsets = [0, 256], sizes = [8, 256], strides = [1, 1]} : vector<8x512xf32> to vector<8x256xf32>
    %cst_22 = arith.constant dense<0.000000e+00> : vector<8xf32>
    %71 = vector.multi_reduction <add>, %70, %cst_22 [1] : vector<8x256xf32> to vector<8xf32>
    %72 = vector.shape_cast %71 : vector<8xf32> to vector<8x1xf32>
    %cst_23 = arith.constant 3.906250e-03 : f32
    %73 = vector.broadcast %cst_23 : f32 to vector<8x1xf32>
    %74 = arith.mulf %72, %73 : vector<8x1xf32>
    %75 = vector.broadcast %74 : vector<8x1xf32> to vector<8x10xf32>
    %76 = arith.mulf %75, %60 : vector<8x10xf32>
    %cst_24 = arith.constant dense<0.000000e+00> : vector<10xf32>
    %77 = vector.multi_reduction <add>, %76, %cst_24 [0] : vector<8x10xf32> to vector<10xf32>
    %78 = vector.shape_cast %77 : vector<10xf32> to vector<1x10xf32>
    %79 = tpu.concatenate %69, %78 in 0 : vector<1x10xf32>, vector<1x10xf32> -> vector<2x10xf32>
    %c0_25 = arith.constant 0 : index
    %c0_26 = arith.constant 0 : index
    %80 = vector.load %arg7[%c0_25, %c0_26] : memref<1x10xf32, #tpu.memory_space<vmem>>, vector<1x10xf32>
    %81 = vector.broadcast %80 : vector<1x10xf32> to vector<2x10xf32>
    %82 = arith.addf %79, %81 : vector<2x10xf32>
    %c0_27 = arith.constant 0 : index
    %c0_28 = arith.constant 0 : index
    %83 = vector.load %arg8[%c0_27, %c0_28] : memref<2x10xf32, #tpu.memory_space<vmem>>, vector<2x10xf32>
    tpu.vector_store %arg8[%c0_27, %c0_28], %82 {strides = array<i32>} : memref<2x10xf32, #tpu.memory_space<vmem>>, vector<2x10xf32>,
    return
  }
}

</mosaic_0001>

<bundles_post_ra>
// kernel: model_with_transforms_forward.1
= control target key start
LH: loop header
LB: loop body
LE: loop exit
PB: predicated region body
PF: predicated region fallthrough
CT: control target
= control target key end

     0   :  { %v849_v1 = vmov 0   ;;  %s1332_s0 = inlined_call_operand.vmem [shape: f32[6,256], index: 0, kind: input, shape index: {}]   ;;  %s1333_s1 = inlined_call_operand.vmem [shape: f32[3,1], index: 1, kind: input, shape index: {}]   ;;  %s1334_s2 = inlined_call_operand.vmem [shape: f32[3,1], index: 2, kind: input, shape index: {}]   ;;  %s1335_s3 = inlined_call_operand.vmem [shape: f32[8,27], index: 3, kind: input, shape index: {}]   ;;  %s1336_s4 = inlined_call_operand.vmem [shape: f32[8,1], index: 4, kind: input, shape index: {}]   ;;  %s1337_s5 = inlined_call_operand.vmem [shape: f32[9,512], index: 5, kind: input, shape index: {}]   ;;  %s1338_s6 = inlined_call_operand.vmem [shape: f32[8,10], index: 6, kind: input, shape index: {}]   ;;  %s1339_s7 = inlined_call_operand.vmem [shape: f32[1,10], index: 7, kind: input, shape index: {}]   ;;  %s1340_s8 = inlined_call_operand.hbm [shape: f32[2,10], index: 8, kind: output, shape index: {}]  }
   0x1   :  { %v125_v0 = vld [vmem:[%s1333_s1] sm:$0x7]  ;;  %824 = vset.pattern.permute.xlu0 %v849_v1 }
   0x2   :  { %128 = vperm.xlu0 %824, %v125_v0   ;;  %v135_v2 = vld [vmem:[%s1334_s2] sm:$0x7] }
   0x6   :  { %138 = vperm.xlu0 %824, %v135_v2  }
   0x7   :  { %13 = vsyncpa [#allocation3], 0  ;;  %v34_v3 = vlaneseq  ;;  %v777_v6 = vld [vmem:[%s1332_s0 + $0x1] ss:$8 sm:$0x3]  ;;  %vm115_vm0 = vcmask 1040384  }
   0x8   :  { %v778_v7 = vld [vmem:[%s1332_s0 + $0x4] ss:$8 sm:$0x3]  ;;  %v30_v8 = vld [vmem:[%s1332_s0] ss:$8 sm:$0x3] }
   0x9   :  { %v913_v4 = vshrl.u32 %v34_v3, 7  ;;  %v779_v9 = vld [vmem:[%s1332_s0 + $0x2] ss:$8 sm:$0x3]  ;;  %vm120_vm1 = vcmask 1041408   ;;  %s851_s19 = smov 1  }
   0xa   :  { %v780_v13 = vld [vmem:[%s1332_s0 + $0x5] ss:$8 sm:$0x3]  ;;  %v776_v14 = vld [vmem:[%s1332_s0 + $0x3] ss:$8 sm:$0x3] }
   0xb   :  { %v916_v5 = vsub.s32 0, %v913_v4  ;;  %v931_v10 = vsub.s32 1, %v913_v4  ;;  %s850_s0 = smov 15   ;;  %s852_s20 = smov 16   ;;  %v858_v51 = vmov 0.0   ;;  %v557_v52 = vld [vmem:[%s1336_s4] sm:$0xff] }
   0xc   :  { %s853_s21 = smov 127   ;;  %s854_s22 = smov 17   ;;  %643 = vmatprep.mubr.f32.mxu0 %v858_v51  ;;  %714 = vmatprep.mubr.f32.mxu1 %v858_v51  ;;  %v289_v59 = vsub.s32 4, %v913_v4  ;;  %v1010_v60 = vld [vmem:[%s1337_s5 + $0x8] sm:$0xff]  ;;  %v1015_v61 = vld [vmem:[%s1337_s5 + $0x18] sm:$0xff]  ;;  %v1020_v62 = vld [vmem:[%s1337_s5 + $0x10] sm:$0xff] }
   0xd   :  { %v63_v11 = vrot.slane %v777_v6, %v916_v5  ;;  %v72_v12 = vrot.slane %v778_v7, %v916_v5  ;;  %v37_v15 = vrot.slane %v30_v8, %v916_v5  ;;  %v85_v16 = vrot.slane %v779_v9, %v916_v5  ;;  %s855_s23 = smov 113   ;;  %s856_s24 = smov 112   ;;  %v1025_v63 = vld [vmem:[%s1337_s5] sm:$0xff] }
   0xe   :  { %v94_v17 = vrot.slane %v780_v13, %v916_v5  ;;  %v48_v18 = vrot.slane %v776_v14, %v916_v5  ;;  %v67_v19 = vrot.slane %v777_v6, %v931_v10  ;;  %v41_v22 = vrot.slane %v30_v8, %v931_v10  ;;  %s857_s25 = smov 111  }
   0xf   :  { %v99_v20 = vrot.slane %v63_v11, 7  ;;  %v101_v21 = vrot.slane %v72_v12, 7  ;;  %v89_v23 = vrot.slane %v779_v9, %v931_v10  ;;  %v107_v24 = vrot.slane %v85_v16, 6 }
  0x10   :  { %v109_v25 = vrot.slane %v94_v17, 6  ;;  %v76_v26 = vrot.slane %v778_v7, %v931_v10  ;;  %v100_v27 = vrot.slane %v67_v19, 7  ;;  %v98_v31 = vrot.slane %v780_v13, %v931_v10 }
  0x11   :  { %v116_v28 = vsel %vm115_vm0, %v37_v15, %v99_v20  ;;  %v118_v29 = vsel %vm115_vm0, %v48_v18, %v101_v21  ;;  %v108_v32 = vrot.slane %v89_v23, 6  ;;  %v52_v35 = vrot.slane %v776_v14, %v931_v10 }
  0x12   :  { %v121_v33 = vsel %vm120_vm1, %v116_v28, %v107_v24  ;;  %v123_v34 = vsel %vm120_vm1, %v118_v29, %v109_v25  ;;  %v102_v36 = vrot.slane %v76_v26, 7  ;;  %v117_v37 = vsel %vm115_vm0, %v41_v22, %v100_v27 }
  0x13   :  { %v110_v40 = vrot.slane %v98_v31, 6  ;;  %v122_v41 = vsel %vm120_vm1, %v117_v37, %v108_v32  ;;  %v294_v2 = vrot.slane %v1010_v60, %v289_v59  ;;  %v302_v6 = vrot.slane %v1015_v61, %v289_v59 }
  0x14   :  { %v119_v43 = vsel %vm115_vm0, %v52_v35, %v102_v36  ;;  %v1032_v7 = vand.u32 127, %v34_v3  ;;  %v290_v8 = vrot.slane %v1025_v63, %v289_v59  ;;  %v298_v9 = vrot.slane %v1020_v62, %v289_v59 }
  0x15   :  { %v124_v47 = vsel %vm120_vm1, %v119_v43, %v110_v40  ;;  %v1037_v11 = vsub.s32 2, %v913_v4  ;;  %v1040_v12 = vsub.s32 3, %v913_v4  ;;  %v1077_v28 = vsub.s32 5, %v913_v4 }
  0x16   :  { %vm229_vm2 = vcmp.lt.s32.totalorder %v1032_v7, 15  ;;  %vm262_vm3 = vcmp.lt.s32.totalorder %v1032_v7, 1  ;;  %vm196_vm4 = vcmp.lt.s32.totalorder %v1032_v7, 16  ;;  %v208_v31 = vrot.slane %v1010_v60, %v931_v10 }
  0x17   :  { %v241_v18 = vrot.slane %v1010_v60, %v1037_v11  ;;  %v245_v19 = vrot.slane %v1020_v62, %v1037_v11  ;;  %v237_v20 = vrot.slane %v1025_v63, %v1037_v11  ;;  %v249_v21 = vrot.slane %v1015_v61, %v1037_v11 }
  0x18   :  { %v274_v22 = vrot.slane %v1010_v60, %v1040_v12  ;;  %v278_v23 = vrot.slane %v1020_v62, %v1040_v12  ;;  %v270_v24 = vrot.slane %v1025_v63, %v1040_v12  ;;  %v282_v27 = vrot.slane %v1015_v61, %v1040_v12 }
  0x19   :  { %v212_v36 = vrot.slane %v1020_v62, %v931_v10  ;;  %v204_v37 = vrot.slane %v1025_v63, %v931_v10  ;;  %vm315_vm5 = vcmp.lt.s32.totalorder %v1032_v7, 127  ;;  %v323_v43 = vrot.slane %v1025_v63, %v1077_v28 }
  0x1a   :  { %vm537_vm6 = vcmask 1043456   ;;  %vm163_vm7 = vcmp.lt.s32.totalorder %v1032_v7, 17  ;;  %vm523_vm8 = vcmask 1042432   ;;  %vm542_vm9 = vcmask 1046528  }
  0x1b   :  { %vm528_vm10 = vcmask 1045504   ;;  %vm348_vm11 = vcmp.lt.s32.totalorder %v1032_v7, 113  ;;  %vm381_vm12 = vcmp.lt.s32.totalorder %v1032_v7, 112  ;;  %vm414_vm13 = vcmp.lt.s32.totalorder %v1032_v7, 111  ;;  %v556_v7 = vld [vmem:[%s1335_s3] sm:$0xff] }
  0x1c   :  { %vm551_vm14 = vcmask 1044480   ;;  %vm859_vm15 = vmmov 1  }
  0x81   :  { %v129_v30 = vpop.permute.xlu0 %128 }
  0x82   :  { %v131_v38 = vsub.f32 %v121_v33, %v129_v30  ;;  %v133_v39 = vsub.f32 %v123_v34, %v129_v30  ;;  %v132_v46 = vsub.f32 %v122_v41, %v129_v30  ;;  %v134_v49 = vsub.f32 %v124_v47, %v129_v30 }
  0x83   :  { %v216_v41 = vrot.slane %v1015_v61, %v931_v10 }
  0x85   :  { %v139_v42 = vpop.permute.xlu0 %138 }
  0x86   :  { %v958_v44 = vmul.f32 %v139_v42, %v131_v38  ;;  %v960_v45 = vmul.f32 %v139_v42, %v133_v39  ;;  %v965_v48 = vmul.f32 %v139_v42, %v132_v46  ;;  %v969_v50 = vmul.f32 %v139_v42, %v134_v49 }
  0x87   :  { %v335_v46 = vrot.slane %v1015_v61, %v1077_v28 }
  0x88   :  { %225 = vrot.lane.b32.xlu0 %v960_v45, %s850_s0  ;;  %221 = vrot.lane.b32.xlu1 %v958_v44, %s850_s0  ;;  %v1045_v15 = vmul.f32 %v294_v2, %v965_v48  ;;  %v1048_v16 = vmul.f32 %v302_v6, %v969_v50  ;;  %v1052_v3 = vmul.f32 %v290_v8, %v958_v44 }
  0x89   :  { %v1055_v17 = vmul.f32 %v298_v9, %v960_v45  ;;  %v171_v2 = vrot.slane %v1025_v63, %v916_v5  ;;  %v183_v6 = vrot.slane %v1015_v61, %v916_v5 }
  0x8a   :  { %v480_v29 = vrot.slane %v1045_v15, 4  ;;  %v482_v30 = vrot.slane %v1048_v16, 4  ;;  %v479_v32 = vrot.slane %v1052_v3, 4 }
  0x8b   :  { %v481_v33 = vrot.slane %v1055_v17, 4 }
  0x8c   :  { %254 = vrot.lane.b32.xlu0 %v958_v44, %s851_s19  ;;  %223 = vrot.lane.b32.xlu1 %v965_v48, %s850_s0 }
  0x90   :  { %258 = vrot.lane.b32.xlu0 %v960_v45, %s851_s19  ;;  %227 = vrot.lane.b32.xlu1 %v969_v50, %s850_s0 }
  0x94   :  { %188 = vrot.lane.b32.xlu0 %v958_v44, %s852_s20  ;;  %256 = vrot.lane.b32.xlu1 %v965_v48, %s851_s19 }
  0x98   :  { %192 = vrot.lane.b32.xlu0 %v960_v45, %s852_s20  ;;  %260 = vrot.lane.b32.xlu1 %v969_v50, %s851_s19 }
  0x9c   :  { %307 = vrot.lane.b32.xlu0 %v958_v44, %s853_s21  ;;  %190 = vrot.lane.b32.xlu1 %v965_v48, %s852_s20 }
  0xa0   :  { %311 = vrot.lane.b32.xlu0 %v960_v45, %s853_s21  ;;  %194 = vrot.lane.b32.xlu1 %v969_v50, %s852_s20 }
  0xa4   :  { %153 = vrot.lane.b32.xlu0 %v958_v44, %s854_s22  ;;  %309 = vrot.lane.b32.xlu1 %v965_v48, %s853_s21 }
  0xa8   :  { %157 = vrot.lane.b32.xlu0 %v960_v45, %s854_s22  ;;  %313 = vrot.lane.b32.xlu1 %v969_v50, %s853_s21  ;;  %s860_s21 = smov [#allocation2]  }
  0xac   :  { %340 = vrot.lane.b32.xlu0 %v958_v44, %s855_s23  ;;  %155 = vrot.lane.b32.xlu1 %v965_v48, %s854_s22 }
  0xb0   :  { %344 = vrot.lane.b32.xlu0 %v960_v45, %s855_s23  ;;  %159 = vrot.lane.b32.xlu1 %v969_v50, %s854_s22  ;;  %s768_s22 = sshll.u32 %s860_s21, 4  ;;  %s769_s22 = int_to_ptr.vmem [resolvable:$true] %s768_s22 }
  0xb1   :  { %p830_p1 = scmp.lt.s32.totalorder %s769_s22, %s769_s22 }
  0xb4   :  { %373 = vrot.lane.b32.xlu0 %v958_v44, %s856_s24  ;;  %342 = vrot.lane.b32.xlu1 %v965_v48, %s855_s23 }
  0xb8   :  { %377 = vrot.lane.b32.xlu0 %v960_v45, %s856_s24  ;;  %346 = vrot.lane.b32.xlu1 %v969_v50, %s855_s23  ;;  %s825_s23 = scalar_lea.vmem %s769_s22, 32 }
  0xb9   :  { %p826_p0 = scmp.ne.s32.totalorder %s769_s22, %s825_s23  ;;  %p831_p2 = scmp.lt.s32.totalorder %s825_s23, %s825_s23 }
  0xbb   :  { %p832_p3 = por %p831_p2, %p830_p1 }
  0xbc   :  { %406 = vrot.lane.b32.xlu0 %v958_v44, %s857_s25  ;;  %375 = vrot.lane.b32.xlu1 %v965_v48, %s856_s24  ;;  %v327_v44 = vrot.slane %v1010_v60, %v1077_v28 }
  0xbd   :  { %p833_p4 = pnand %p832_p3, %p826_p0 }
  0xc0   :  { %410 = vrot.lane.b32.xlu0 %v960_v45, %s857_s25  ;;  %379 = vrot.lane.b32.xlu1 %v969_v50, %s856_s24  ;;  %v331_v45 = vrot.slane %v1020_v62, %v1077_v28 }
  0xc4   :  { %560 = vperm.xlu0 %824, %v557_v52   ;;  %408 = vrot.lane.b32.xlu1 %v965_v48, %s857_s25 }
  0xc8   :  { %412 = vrot.lane.b32.xlu1 %v969_v50, %s857_s25 }
  0xfa   :  { %v1002_v53 = vpop.permute.xlu0 %225  ;;  %v222_v54 = vpop.permute.xlu1 %221 }
  0xfe   :  { %v1004_v55 = vpop.permute.xlu0 %254  ;;  %v224_v56 = vpop.permute.xlu1 %223 }
  0xff   :  { %v232_v34 = vsel %vm229_vm2, %v222_v54, %v224_v56  ;;  %v231_v38 = vsel %vm229_vm2, %v224_v56, %v1002_v53 }
 0x100   :  { %v1111_v47 = vmul.f32 %v241_v18, %v232_v34  ;;  %v1117_v50 = vmul.f32 %v245_v19, %v231_v38 }
 0x102   :  { %v259_v57 = vpop.permute.xlu0 %258  ;;  %v228_v58 = vpop.permute.xlu1 %227  ;;  %v456_v12 = vrot.slane %v1111_v47, 2 }
 0x103   :  { %v233_v10 = vsel %vm229_vm2, %v228_v58, %v222_v54  ;;  %v230_v51 = vsel %vm229_vm2, %v1002_v53, %v228_v58  ;;  %v175_v54 = vrot.slane %v1010_v60, %v916_v5  ;;  %vm1286_vm2 = vmpackc.low %vm523_vm8, %vm859_vm15 }
 0x104   :  { %v1134_v53 = vmul.f32 %v237_v20, %v233_v10  ;;  %v1140_v8 = vmul.f32 %v249_v21, %v230_v51 }
 0x106   :  { %v1027_v0 = vpop.permute.xlu0 %188  ;;  %v257_v1 = vpop.permute.xlu1 %256 }
 0x107   :  { %v265_v35 = vsel %vm262_vm3, %v1004_v55, %v257_v1  ;;  %v264_v39 = vsel %vm262_vm3, %v257_v1, %v259_v57 }
 0x108   :  { %v284_v48 = vmul.f32 %v274_v22, %v265_v35  ;;  %v285_v52 = vmul.f32 %v278_v23, %v264_v39 }
 0x10a   :  { %v1042_v13 = vpop.permute.xlu0 %192  ;;  %v261_v14 = vpop.permute.xlu1 %260  ;;  %v468_v9 = vrot.slane %v284_v48, 7  ;;  %v469_v18 = vrot.slane %v285_v52, 7 }
 0x10b   :  { %v263_v49 = vsel %vm262_vm3, %v259_v57, %v261_v14  ;;  %v266_v56 = vsel %vm262_vm3, %v261_v14, %v1004_v55  ;;  %v179_v57 = vrot.slane %v1020_v62, %v916_v5  ;;  %v457_v14 = vrot.slane %v1117_v50, 2 }
 0x10c   :  { %v286_v58 = vmul.f32 %v282_v27, %v263_v49  ;;  %v283_v11 = vmul.f32 %v270_v24, %v266_v56  ;;  %v455_v27 = vrot.slane %v1134_v53, 2  ;;  %vm563_vm3 = vcmask 220160  }
 0x10e   :  { %v1072_v25 = vpop.permute.xlu0 %307  ;;  %v191_v26 = vpop.permute.xlu1 %190  ;;  %v470_v28 = vrot.slane %v286_v58, 7  ;;  %v467_v35 = vrot.slane %v283_v11, 7 }
 0x10f   :  { %v199_v19 = vsel %vm196_vm4, %v1027_v0, %v191_v26  ;;  %v198_v5 = vsel %vm196_vm4, %v191_v26, %v1042_v13 }
 0x110   :  { %v218_v38 = vmul.f32 %v208_v31, %v199_v19  ;;  %v219_v39 = vmul.f32 %v212_v36, %v198_v5  ;;  %v535_v31 = vsel %vm115_vm0, %v457_v14, %v469_v18 }
 0x112   :  { %v312_v40 = vpop.permute.xlu0 %311  ;;  %v195_v42 = vpop.permute.xlu1 %194 }
 0x113   :  { %v197_v20 = vsel %vm196_vm4, %v1042_v13, %v195_v42  ;;  %v200_v21 = vsel %vm196_vm4, %v195_v42, %v1027_v0  ;;  %v458_v13 = vrot.slane %v1140_v8, 2  ;;  %v534_v0 = vsel %vm115_vm0, %v456_v12, %v468_v9 }
 0x114   :  { %v217_v42 = vmul.f32 %v204_v37, %v200_v21  ;;  %vm760_vm4 = vcmask 74752  }
 0x116   :  { %v1125_v59 = vpop.permute.xlu0 %153  ;;  %v310_v1 = vpop.permute.xlu1 %309  ;;  %v443_v53 = vrot.slane %v217_v42, 5 }
 0x117   :  { %v317_v55 = vsel %vm315_vm5, %v310_v1, %v312_v40  ;;  %v318_v34 = vsel %vm315_vm5, %v1072_v25, %v310_v1  ;;  %v445_v1 = vrot.slane %v219_v39, 5 }
 0x118   :  { %v1156_v22 = vmul.f32 %v327_v44, %v317_v55  ;;  %v220_v44 = vmul.f32 %v216_v41, %v197_v20  ;;  %v1169_v10 = vmul.f32 %v323_v43, %v318_v34  ;;  %v536_v41 = vsel %vm115_vm0, %v458_v13, %v470_v28 }
 0x119   :  { %v444_v43 = vrot.slane %v218_v38, 5  ;;  %v533_v55 = vsel %vm115_vm0, %v455_v27, %v467_v35  ;;  %v355_v28 = vsub.s32 6, %v913_v4  ;;  %v541_v34 = vsel %vm537_vm6, %v536_v41, %v482_v30 }
 0x11a   :  { %v158_v23 = vpop.permute.xlu0 %157  ;;  %v314_v24 = vpop.permute.xlu1 %313  ;;  %v492_v48 = vrot.slane %v1156_v22, 1  ;;  %v446_v58 = vrot.slane %v220_v44, 5  ;;  %v491_v8 = vrot.slane %v1169_v10, 1  ;;  %v783_v22 = vld [vmem:[%s1337_s5 + $0x30] ss:$0 sm:$0xff] }
 0x11b   :  { %v319_v26 = vsel %vm315_vm5, %v314_v24, %v1072_v25  ;;  %v316_v47 = vsel %vm315_vm5, %v312_v40, %v314_v24  ;;  %v539_v40 = vsel %vm537_vm6, %v534_v0, %v480_v29  ;;  %v360_v39 = vrot.slane %v1010_v60, %v355_v28 }
 0x11c   :  { %v1172_v49 = vmul.f32 %v335_v46, %v319_v26  ;;  %v1188_v46 = vmul.f32 %v331_v45, %v316_v47  ;;  %v544_v45 = vsel %vm542_vm9, %v539_v40, %v492_v48  ;;  %v364_v41 = vrot.slane %v1020_v62, %v355_v28 }
 0x11e   :  { %v1174_v51 = vpop.permute.xlu0 %340  ;;  %v156_v25 = vpop.permute.xlu1 %155  ;;  %v494_v9 = vrot.slane %v1172_v49, 1  ;;  %v493_v5 = vrot.slane %v1188_v46, 1 }
 0x11f   :  { %v165_v36 = vsel %vm163_vm7, %v156_v25, %v158_v23  ;;  %v166_v37 = vsel %vm163_vm7, %v1125_v59, %v156_v25 }
 0x120   :  { %v185_v52 = vmul.f32 %v175_v54, %v166_v37  ;;  %v186_v56 = vmul.f32 %v179_v57, %v165_v36  ;;  %v546_v17 = vsel %vm542_vm9, %v541_v34, %v494_v9 }
 0x122   :  { %v345_v11 = vpop.permute.xlu0 %344  ;;  %v160_v15 = vpop.permute.xlu1 %159  ;;  %v525_v29 = vsel %vm523_vm8, %v185_v52, %v444_v43  ;;  %v526_v19 = vsel %vm523_vm8, %v186_v56, %v445_v1  ;;  %v368_v43 = vrot.slane %v1015_v61, %v355_v28 }
 0x123   :  { %v164_v54 = vsel %vm163_vm7, %v158_v23, %v160_v15  ;;  %v167_v57 = vsel %vm163_vm7, %v160_v15, %v1125_v59  ;;  %v530_v18 = vsel %vm528_vm10, %v525_v29, %v456_v12  ;;  %v540_v23 = vsel %vm537_vm6, %v535_v31, %v481_v33 }
 0x124   :  { %v184_v20 = vmul.f32 %v171_v2, %v167_v57  ;;  %v187_v21 = vmul.f32 %v183_v6, %v164_v54  ;;  %v792_v24 = vpack.c.bf16 %v544_v45, %v530_v18  ;;  %v538_v2 = vsel %vm537_vm6, %v533_v55, %v479_v32 }
 0x125   :  { %v531_v16 = vsel %vm528_vm10, %v526_v19, %v457_v14  ;;  %v543_v6 = vsel %vm542_vm9, %v538_v2, %v491_v8  ;;  %v545_v32 = vsel %vm542_vm9, %v540_v23, %v493_v5  ;;  %v388_v14 = vsub.s32 7, %v913_v4 }
 0x126   :  { %v374_v59 = vpop.permute.xlu0 %373  ;;  %793 = vmatprep.subr.bf16.mxu0 %v792_v24  ;;  %v343_v12 = vpop.permute.xlu1 %342  ;;  %v527_v26 = vsel %vm523_vm8, %v187_v21, %v446_v58  ;;  %v524_v35 = vsel %vm523_vm8, %v184_v20, %v443_v53  ;;  %v804_v50 = vpack.c.bf16 %v545_v32, %v531_v16  ;;  %v782_v20 = vld [vmem:[%s1337_s5 + $0x28] ss:$0 sm:$0xff] }
 0x127   :  { %v532_v30 = vsel %vm528_vm10, %v527_v26, %v458_v13  ;;  %v529_v33 = vsel %vm528_vm10, %v524_v35, %v455_v27  ;;  %v356_v27 = vrot.slane %v1025_v63, %v355_v28  ;;  %v350_v42 = vsel %vm348_vm11, %v343_v12, %v345_v11 }
 0x128   :  { %v802_v38 = vpack.c.bf16 %v546_v17, %v532_v30  ;;  %v794_v3 = vpack.c.bf16 %v543_v6, %v529_v33  ;;  %v351_v44 = vsel %vm348_vm11, %v1174_v51, %v343_v12  ;;  %v389_v4 = vrot.slane %v1025_v63, %v388_v14 }
 0x129   :  { %v393_v47 = vrot.slane %v1010_v60, %v388_v14  ;;  %v369_v31 = vmul.f32 %v356_v27, %v351_v44  ;;  %v370_v36 = vmul.f32 %v360_v39, %v350_v42  ;;  %v397_v56 = vrot.slane %v1020_v62, %v388_v14 }
 0x12a   :  { %v378_v13 = vpop.permute.xlu0 %377  ;;  %803 = vmatprep.subr.bf16.mxu1 %v802_v38  ;;  %v347_v0 = vpop.permute.xlu1 %346  ;;  %795 = vmatpush1.bf16.msra.mxu0 %v794_v3  ;;  %v401_v63 = vrot.slane %v1015_v61, %v388_v14 }
 0x12b   :  { %805 = vmatpush1.bf16.msra.mxu1 %v804_v50  ;;  %v349_v60 = vsel %vm348_vm11, %v345_v11, %v347_v0  ;;  %v352_v1 = vsel %vm348_vm11, %v347_v0, %v1174_v51  ;;  %v503_v15 = vrot.slane %v369_v31, 6  ;;  %v504_v29 = vrot.slane %v370_v36, 6  ;;  %v781_v51 = vld [vmem:[%s1337_s5 + $0x20] ss:$0 sm:$0xff] }
 0x12c   :  { %v371_v54 = vmul.f32 %v364_v41, %v349_v60  ;;  %v372_v61 = vmul.f32 %v368_v43, %v352_v1 }
 0x12d   :  { %v547_v28 = vsel %vm120_vm1, %v491_v8, %v503_v15  ;;  %v548_v34 = vsel %vm120_vm1, %v492_v48, %v504_v29  ;;  %v784_v48 = vld [vmem:[%s1337_s5 + $0x38] ss:$0 sm:$0xff] }
 0x12e   :  { %v376_v25 = vpop.permute.xlu1 %375  ;;  %v407_v52 = vpop.permute.xlu0 %406  ;;  %v505_v12 = vrot.slane %v371_v54, 6  ;;  %v506_v26 = vrot.slane %v372_v61, 6 }
 0x12f   :  { %v383_v37 = vsel %vm381_vm12, %v376_v25, %v378_v13  ;;  %v384_v40 = vsel %vm381_vm12, %v374_v59, %v376_v25 }
 0x130   :  { %v402_v53 = vmul.f32 %v389_v4, %v384_v40  ;;  %v403_v58 = vmul.f32 %v393_v47, %v383_v37  ;;  %v549_v50 = vsel %vm120_vm1, %v493_v5, %v505_v12  ;;  %v550_v14 = vsel %vm120_vm1, %v494_v9, %v506_v26 }
 0x131   :  { %vm731_vm1 = vcmask 80896  }
 0x132   :  { %v380_v55 = vpop.permute.xlu1 %379  ;;  %v515_v11 = vrot.slane %v402_v53, 3  ;;  %v516_v57 = vrot.slane %v403_v58, 3  ;;  %v411_v21 = vpop.permute.xlu0 %410 }
 0x133   :  { %v382_v45 = vsel %vm381_vm12, %v378_v13, %v380_v55  ;;  %v385_v62 = vsel %vm381_vm12, %v380_v55, %v374_v59 }
 0x134   :  { %v404_v18 = vmul.f32 %v397_v56, %v382_v45  ;;  %v405_v19 = vmul.f32 %v401_v63, %v385_v62  ;;  %v552_v10 = vsel %vm551_vm14, %v547_v28, %v515_v11  ;;  %v553_v8 = vsel %vm551_vm14, %v548_v34, %v516_v57  ;;  %v725_v63 = vld [vmem:[%s1338_s6] sm:$0xff] }
 0x135   :  { %v791_v34 = vld [vmem:[%s1339_s7] ss:$0 sm:$0xff] }
 0x136   :  { %v409_v24 = vpop.permute.xlu1 %408  ;;  %v517_v16 = vrot.slane %v404_v18, 3  ;;  %v518_v30 = vrot.slane %v405_v19, 3 }
 0x137   :  { %v416_v23 = vsel %vm414_vm13, %v409_v24, %v411_v21  ;;  %v417_v59 = vsel %vm414_vm13, %v407_v52, %v409_v24 }
 0x138   :  { %v435_v35 = vmul.f32 %v781_v51, %v417_v59  ;;  %v436_v2 = vmul.f32 %v782_v20, %v416_v23  ;;  %v554_v27 = vsel %vm551_vm14, %v549_v50, %v517_v16  ;;  %v555_v39 = vsel %vm551_vm14, %v550_v14, %v518_v30 }
 0x13a   :  { %v796_v33 = vpack.c.bf16 %v436_v2, %v553_v8  ;;  %v799_v6 = vpack.c.bf16 %v435_v35, %v552_v10  ;;  %v413_v38 = vpop.permute.xlu1 %412 }
 0x13b   :  { %v415_v3 = vsel %vm414_vm13, %v411_v21, %v413_v38  ;;  %v418_v32 = vsel %vm414_vm13, %v413_v38, %v407_v52 }
 0x13c   :  { %v437_v13 = vmul.f32 %v783_v22, %v415_v3  ;;  %v438_v0 = vmul.f32 %v784_v48, %v418_v32  ;;  %798 = vmatprep.subr.msk.bf16.mxu0 %vm1286_vm2, %v796_v33 }
 0x13d   :  { %801 = vmatpush1.bf16.msk.msra.mxu0 %vm1286_vm2, %v799_v6 }
 0x13e   :  { %v806_v49 = vpack.c.bf16 %v438_v0, %v555_v39  ;;  %v809_v46 = vpack.c.bf16 %v437_v13, %v554_v27 }
 0x140   :  { %787 = vmatmul.mubr.msk.f32.vlgmr.msra.gmra.mrb[0].mxu0 %vm563_vm3, %v556_v7  ;;  %808 = vmatprep.subr.msk.bf16.mxu1 %vm1286_vm2, %v806_v49 }
 0x141   :  { %811 = vmatpush1.bf16.msk.msra.mxu1 %vm1286_vm2, %v809_v46 }
 0x143   :  { %v561_v9 = vpop.permute.xlu0 %560 }
 0x144   :  { %790 = vmatmul.mubr.msk.f32.vlgmr.msra.gmra.mrb[0].mxu1 %vm563_vm3, %v556_v7 }
 0x213   :  { %v645_v5 = vpop.f32.mrb[0].mxu0 }
 0x214   :  { %v646_v42 = vadd.f32 %v645_v5, %v561_v9  ;;  %v647_v44 = vpop.f32.mrb[1].mxu0 }
 0x215   :  { %v648_v4 = vadd.f32 %v647_v44, %v561_v9 }
 0x216   :  { %v721_v47 = vmax.f32 %v646_v42, 0.0 }
 0x217   :  { %v722_v25 = vmax.f32 %v648_v4, 0.0  ;;  %v716_v31 = vpop.f32.mrb[0].mxu1 }
 0x218   :  { %v717_v36 = vadd.f32 %v716_v31, %v561_v9  ;;  %v718_v37 = vpop.f32.mrb[1].mxu1 }
 0x219   :  { %v719_v40 = vadd.f32 %v718_v37, %v561_v9  ;;  %v726_v41 = vadd.f32 %v722_v25, %v721_v47 }
 0x21a   :  { %v723_v43 = vmax.f32 %v717_v36, 0.0 }
 0x21b   :  { %v724_v52 = vmax.f32 %v719_v40, 0.0  ;;  %727 = vadd.xlane.f32.xlu1 %v726_v41 }
 0x21d   :  { %v739_v56 = vadd.f32 %v724_v52, %v723_v43 }
 0x21f   :  { %740 = vadd.xlane.f32.xlu0 %v739_v56 }
 0x2a8   :  { %v728_v60 = vpop.xlane.xlu1 %727 }
 0x2a9   :  { %v729_v1 = vmul.f32 0.00390625, %v728_v60 }
 0x2ab   :  { %v730_v53 = vmul.f32 %v729_v1, %v725_v63 }
 0x2ac   :  { %v741_v58 = vpop.xlane.xlu0 %740 }
 0x2ad   :  { %v732_v55 = vsel %vm731_vm1, %v730_v53, 0.0  ;;  %v742_v15 = vmul.f32 0.00390625, %v741_v58 }
 0x2ae   :  { %v733_v29 = vrot.slane %v732_v55, 4 }
 0x2af   :  { %v743_v45 = vmul.f32 %v742_v15, %v725_v63 }
 0x2b0   :  { %v734_v62 = vadd.f32 %v733_v29, %v732_v55 }
 0x2b1   :  { %v744_v54 = vsel %vm731_vm1, %v743_v45, 0.0 }
 0x2b2   :  { %v735_v61 = vrot.slane %v734_v62, 2  ;;  %v745_v11 = vrot.slane %v744_v54, 4 }
 0x2b4   :  { %v736_v57 = vadd.f32 %v735_v61, %v734_v62  ;;  %v746_v18 = vadd.f32 %v745_v11, %v744_v54 }
 0x2b6   :  { %v747_v19 = vrot.slane %v746_v18, 2  ;;  %v737_v51 = vrot.slane %v736_v57, 1 }
 0x2b8   :  { %v748_v20 = vadd.f32 %v747_v19, %v746_v18  ;;  %v738_v24 = vadd.f32 %v737_v51, %v736_v57 }
 0x2ba   :  { %v749_v21 = vrot.slane %v748_v20, 1 }
 0x2bc   :  { %v750_v28 = vadd.f32 %v749_v21, %v748_v20 }
 0x2be   :  { %v751_v23 = vsel %vm115_vm0, %v738_v24, %v750_v28 }
 0x2bf   :  { %v759_v59 = vadd.f32 %v791_v34, %v751_v23 }
 0x2c1   :  { %761 = vst.msk [vmem:[#allocation2] sm:$0x3] %vm760_vm4, %v759_v59 }
 0x2c2   :  { %836 = shalt.err (!%p833_p4)
}
 0x2c3   :  { %s837_s26 = scalar_lea.hbm %s1340_s8, 32 }
 0x2c4   :  { %p838_p5 = scmp.ne.s32.totalorder %s1340_s8, %s837_s26  ;;  %p841_p6 = scmp.lt.u32.totalorder %s837_s26, %s1340_s8 }
 0x2c6   :  { %p843_p7 = pnand %p841_p6, %p838_p5 }
 0x2c8   :  { %846 = shalt.err (!%p843_p7)
}
 0x2c9   :  { %771 = dma.vmem_to_hbm [thread:$0]  %s769_s22, 32, %s1340_s8, [#allocation3]  }
 0x2ca   :  { %847 = dma.done.wait [#allocation3], 32  }
 0x2cb   :  { %848 = vsyncadd [#allocation3], 4294967264 }
 0x2cc   :  { %775 = vsyncpa [#allocation3], 1 }

</bundles_post_ra>
